<compile_context>
chip_gen: v7x
topology: tpu7x:2x2x1
jax: 0.10.0
libtpu: 0.0.40
codegen_flags: <defaults>
</compile_context>

<pallas_src>
import functools

import jax
import jax.numpy as jnp
from jax.experimental import pallas as pl
from jax.experimental.pallas import tpu as pltpu


def _round_up(n: int, m: int) -> int:
    return pl.cdiv(n, m) * m


def _pick_tm(B: int, cap: int = 1024) -> int:
    """Batch tile: 8-aligned, capped, minimal batch padding, >=2 grid steps when possible."""
    b8 = _round_up(B, 8)
    tm = min(cap, b8)
    # Re-derive the tile from the tile COUNT so B_p never balloons by ~a full tile
    # (e.g. B=520 with tm=512 would otherwise pad to 1024 rows).
    n_tiles = pl.cdiv(b8, tm)
    tm = _round_up(pl.cdiv(b8, n_tiles), 8)
    # Guarantee >= 2 grid steps so the "parallel" batch axis can shard across the two
    # TensorCores on v7x megacore chips (no-op for tiny batches).
    if b8 >= 16 and pl.cdiv(b8, tm) < 2:
        tm = _round_up(pl.cdiv(b8, 2), 8)
    return tm


def mlp_kernel(x_ref, w1_ref, b1_ref, w2_ref, b2_ref, o_ref):
    # x: (TM, D_in), w1: (D_in, H_p), b1: (1, H_p), w2: (H_p, D_out), b2: (1, D_out)
    x = x_ref[...]
    # fc1 on the MXU with f32 accumulation, bias + ReLU on the VPU in f32.
    h = jnp.dot(x, w1_ref[...], preferred_element_type=jnp.float32) + b1_ref[...]
    h = jnp.maximum(h, 0.0)
    # Dropout(p=0.0) == identity -> no-op.
    # fc2: cast h to the weight dtype (bf16 fast path / f32 exact path), f32 accumulation.
    out = jnp.dot(h.astype(w2_ref.dtype), w2_ref[...],
                  preferred_element_type=jnp.float32) + b2_ref[...]
    o_ref[...] = out.astype(o_ref.dtype)


def pad_params(w1, b1, w2, b2, *, use_bf16=True, lane=128):
    """One-time parameter padding/cast, hoisted OUT of the per-call forward path.

    Only the hidden (lane) dim is zero-padded: padded hidden columns stay exactly zero
    through relu(0*x + 0) and contribute nothing to fc2, so the result is exact.
    D_in and D_out are left unpadded so the x and output HBM streams are not inflated.
    """
    D_in, H = w1.shape
    H2, D_out = w2.shape
    assert H2 == H
    H_p = _round_up(H, lane)
    wdt = jnp.bfloat16 if use_bf16 else jnp.float32
    w1p = jnp.pad(w1.astype(wdt), ((0, 0), (0, H_p - H)))
    b1p = jnp.pad(b1.astype(jnp.float32), ((0, 0), (0, H_p - H)))
    w2p = jnp.pad(w2.astype(wdt), ((0, H_p - H), (0, 0)))
    b2p = b2.astype(jnp.float32)
    return w1p, b1p, w2p, b2p


@functools.partial(jax.jit, static_argnames=("tm",))
def improved_nn_forward(x, w1p, b1p, w2p, b2p, *, tm=None):
    """Fused ImprovedNN forward pass.

    x   : (B, D_in)      float32 (cast to the weight dtype for the bf16 fast path)
    w1p : (D_in, H_p)    pre-padded (see pad_params)
    b1p : (1, H_p)       float32
    w2p : (H_p, D_out)   pre-padded
    b2p : (1, D_out)     float32
    returns (B, D_out) float32
    """
    B, D_in = x.shape
    H_p = w1p.shape[1]
    D_out = w2p.shape[1]

    # bf16 fast path: match x to the (pre-cast) weight dtype; accumulation stays f32.
    if x.dtype != w1p.dtype:
        x = x.astype(w1p.dtype)

    if tm is None:
        tm = _pick_tm(B)
    B_p = _round_up(B, tm)
    if B_p != B:
        # Only the batch (sublane) dim ever gets padded; feature dims stay real-width.
        x = jnp.pad(x, ((0, B_p - B), (0, 0)))

    grid = (B_p // tm,)
    itemsize = lambda a: jnp.dtype(a.dtype).itemsize

    flops = 2 * B_p * (D_in * H_p + H_p * D_out)
    bytes_accessed = (
        B_p * D_in * itemsize(x)
        + w1p.size * itemsize(w1p) + b1p.size * itemsize(b1p)
        + w2p.size * itemsize(w2p) + b2p.size * itemsize(b2p)
        + B_p * D_out * 4
    )

    out = pl.pallas_call(
        mlp_kernel,
        out_shape=jax.ShapeDtypeStruct((B_p, D_out), jnp.float32),
        grid_spec=pltpu.PrefetchScalarGridSpec(
            num_scalar_prefetch=0,
            grid=grid,
            in_specs=[
                # x tiles march down the batch; pipelined (double-buffered) by BlockSpec.
                # Last dim == full array dim (D_in), so no lane padding is required.
                pl.BlockSpec((tm, D_in), lambda i: (i, 0)),
                # Weights/biases: whole-array, single copy resident in VMEM for the whole
                # kernel (no per-step DMA, no double-buffering of the resident operands).
                pl.BlockSpec(memory_space=pltpu.MemorySpace.VMEM),  # w1
                pl.BlockSpec(memory_space=pltpu.MemorySpace.VMEM),  # b1
                pl.BlockSpec(memory_space=pltpu.MemorySpace.VMEM),  # w2
                pl.BlockSpec(memory_space=pltpu.MemorySpace.VMEM),  # b2
            ],
            # Real-width output block (last dim == full dim): accepts masked stores but
            # avoids the 64x HBM write inflation of padding D_out=2 up to 128 lanes.
            out_specs=pl.BlockSpec((tm, D_out), lambda i: (i, 0)),
        ),
        compiler_params=pltpu.CompilerParams(
            # Batch axis is embarrassingly parallel -> shard grid across TCs on megacore.
            dimension_semantics=("parallel",),
            # Explicit scoped-VMEM ceiling (above v5e's 16 MiB default, safe on v7x's
            # 64 MiB physical); usage here is far below it even at tm=1024.
            vmem_limit_bytes=32 * 1024 * 1024,
        ),
        cost_estimate=pl.CostEstimate(
            flops=flops, transcendentals=0, bytes_accessed=bytes_accessed),
    )(x, w1p, b1p, w2p, b2p)

    return out[:B] if B_p != B else out


def init_params(key, input_dim, hidden_dim=8, output_dim=2):
    """Deterministic init mimicking nn.Linear's uniform(-1/sqrt(fan_in), 1/sqrt(fan_in))."""
    k1, k2, k3, k4 = jax.random.split(key, 4)
    bound1 = 1.0 / jnp.sqrt(input_dim)
    bound2 = 1.0 / jnp.sqrt(hidden_dim)
    # Stored already transposed relative to PyTorch's (out, in) convention.
    w1 = jax.random.uniform(k1, (input_dim, hidden_dim), jnp.float32, -bound1, bound1)
    b1 = jax.random.uniform(k2, (1, hidden_dim), jnp.float32, -bound1, bound1)
    w2 = jax.random.uniform(k3, (hidden_dim, output_dim), jnp.float32, -bound2, bound2)
    b2 = jax.random.uniform(k4, (1, output_dim), jnp.float32, -bound2, bound2)
    return w1, b1, w2, b2


if __name__ == "__main__":
    key = jax.random.PRNGKey(0)
    k_x, k_p = jax.random.split(key)

    batch, input_dim, hidden_dim, output_dim = 8, 16, 8, 2
    x = jax.random.normal(k_x, (batch, input_dim), jnp.float32)
    w1, b1, w2, b2 = init_params(k_p, input_dim, hidden_dim, output_dim)

    # Pure-JAX reference (same math as the PyTorch module; dropout p=0 is identity).
    ref = jnp.maximum(x @ w1 + b1, 0.0) @ w2 + b2

    # --- Exact f32 path: tight correctness check. ---
    p_f32 = pad_params(w1, b1, w2, b2, use_bf16=False)
    out_f32 = jax.block_until_ready(improved_nn_forward(x, *p_f32))
    assert out_f32.shape == (batch, output_dim)
    assert jnp.allclose(out_f32, ref, atol=1e-5, rtol=1e-5), (
        f"f32 max abs err {jnp.max(jnp.abs(out_f32 - ref))}")

    # --- bf16 MXU fast path (default deployment config): looser tolerance. ---
    p_bf16 = pad_params(w1, b1, w2, b2, use_bf16=True)
    out_bf16 = jax.block_until_ready(improved_nn_forward(x, *p_bf16))
    assert out_bf16.shape == (batch, output_dim)
    assert jnp.allclose(out_bf16, ref, atol=2e-2, rtol=2e-2), (
        f"bf16 max abs err {jnp.max(jnp.abs(out_bf16 - ref))}")

    print("KERNEL_OK")
</pallas_src>

<mosaic_0001>
module attributes {stable_mosaic.version = 11 : i64} {
  func.func @mlp_kernel(%arg0: i32, %arg1: memref<8x16xf32, #tpu.memory_space<vmem>>, %arg2: memref<16x128xf32, #tpu.memory_space<vmem>>, %arg3: memref<1x128xf32, #tpu.memory_space<vmem>>, %arg4: memref<128x2xf32, #tpu.memory_space<vmem>>, %arg5: memref<1x2xf32, #tpu.memory_space<vmem>>, %arg6: memref<8x2xf32, #tpu.memory_space<vmem>>) attributes {dimension_semantics = [#tpu.dimension_semantics<parallel>], iteration_bounds = array<i64: 1>, scalar_prefetch = 0 : i64, scratch_operands = 0 : i64, tpu.core_type = #tpu.core_type<tc>, window_params = [{transform_indices = @transform_0, window_bounds = array<i64: 8, 16>}, {pipeline_mode = #tpu.pipeline_mode<synchronous>, transform_indices = @transform_1, window_bounds = array<i64: 16, 128>}, {pipeline_mode = #tpu.pipeline_mode<synchronous>, transform_indices = @transform_2, window_bounds = array<i64: 1, 128>}, {pipeline_mode = #tpu.pipeline_mode<synchronous>, transform_indices = @transform_3, window_bounds = array<i64: 128, 2>}, {pipeline_mode = #tpu.pipeline_mode<synchronous>, transform_indices = @transform_4, window_bounds = array<i64: 1, 2>}, {transform_indices = @transform_5, window_bounds = array<i64: 8, 2>}]} {
    %c0 = arith.constant 0 : index
    %c0_0 = arith.constant 0 : index
    %0 = vector.load %arg1[%c0, %c0_0] : memref<8x16xf32, #tpu.memory_space<vmem>>, vector<8x16xf32>
    %c0_1 = arith.constant 0 : index
    %c0_2 = arith.constant 0 : index
    %1 = vector.load %arg2[%c0_1, %c0_2] : memref<16x128xf32, #tpu.memory_space<vmem>>, vector<16x128xf32>
    %cst = arith.constant dense<0.000000e+00> : vector<8x128xf32>
    %2 = tpu.matmul %0, %1, %cst {dimension_numbers = #tpu.dot_dimension_numbers<[1], [0], [0], [1], [0, 0, 1, 1], [], []>} : vector<8x16xf32>, vector<16x128xf32>, vector<8x128xf32> -> vector<8x128xf32>
    %c0_3 = arith.constant 0 : index
    %c0_4 = arith.constant 0 : index
    %3 = vector.load %arg3[%c0_3, %c0_4] : memref<1x128xf32, #tpu.memory_space<vmem>>, vector<1x128xf32>
    %4 = vector.broadcast %3 : vector<1x128xf32> to vector<8x128xf32>
    %5 = arith.addf %2, %4 : vector<8x128xf32>
    %cst_5 = arith.constant 0.000000e+00 : f32
    %6 = vector.broadcast %cst_5 : f32 to vector<8x128xf32>
    %7 = arith.maximumf %5, %6 : vector<8x128xf32>
    %c0_6 = arith.constant 0 : index
    %c0_7 = arith.constant 0 : index
    %8 = vector.load %arg4[%c0_6, %c0_7] : memref<128x2xf32, #tpu.memory_space<vmem>>, vector<128x2xf32>
    %cst_8 = arith.constant dense<0.000000e+00> : vector<8x2xf32>
    %9 = tpu.matmul %7, %8, %cst_8 {dimension_numbers = #tpu.dot_dimension_numbers<[1], [0], [0], [1], [0, 0, 1, 1], [], []>} : vector<8x128xf32>, vector<128x2xf32>, vector<8x2xf32> -> vector<8x2xf32>
    %c0_9 = arith.constant 0 : index
    %c0_10 = arith.constant 0 : index
    %10 = vector.load %arg5[%c0_9, %c0_10] : memref<1x2xf32, #tpu.memory_space<vmem>>, vector<1x2xf32>
    %11 = vector.broadcast %10 : vector<1x2xf32> to vector<8x2xf32>
    %12 = arith.addf %9, %11 : vector<8x2xf32>
    %c0_11 = arith.constant 0 : index
    %c0_12 = arith.constant 0 : index
    %13 = vector.load %arg6[%c0_11, %c0_12] : memref<8x2xf32, #tpu.memory_space<vmem>>, vector<8x2xf32>
    tpu.vector_store %arg6[%c0_11, %c0_12], %12 {strides = array<i32>} : memref<8x2xf32, #tpu.memory_space<vmem>>, vector<8x2xf32>,
    return
  }
  func.func @transform_0(%arg0: i32) -> (i32, i32) {
    %c0_i32 = arith.constant 0 : i32
    %c0_i32_0 = arith.constant 0 : i32
    return %arg0, %c0_i32 : i32, i32
  }
  func.func @transform_1(%arg0: i32) -> (i32, i32) {
    %c0_i32 = arith.constant 0 : i32
    %c0_i32_0 = arith.constant 0 : i32
    %c0_i32_1 = arith.constant 0 : i32
    return %c0_i32, %c0_i32_0 : i32, i32
  }
  func.func @transform_2(%arg0: i32) -> (i32, i32) {
    %c0_i32 = arith.constant 0 : i32
    %c0_i32_0 = arith.constant 0 : i32
    %c0_i32_1 = arith.constant 0 : i32
    return %c0_i32, %c0_i32_0 : i32, i32
  }
  func.func @transform_3(%arg0: i32) -> (i32, i32) {
    %c0_i32 = arith.constant 0 : i32
    %c0_i32_0 = arith.constant 0 : i32
    %c0_i32_1 = arith.constant 0 : i32
    return %c0_i32, %c0_i32_0 : i32, i32
  }
  func.func @transform_4(%arg0: i32) -> (i32, i32) {
    %c0_i32 = arith.constant 0 : i32
    %c0_i32_0 = arith.constant 0 : i32
    %c0_i32_1 = arith.constant 0 : i32
    return %c0_i32, %c0_i32_0 : i32, i32
  }
  func.func @transform_5(%arg0: i32) -> (i32, i32) {
    %c0_i32 = arith.constant 0 : i32
    %c0_i32_0 = arith.constant 0 : i32
    return %arg0, %c0_i32 : i32, i32
  }
}

</mosaic_0001>

<bundles_post_ra>
// kernel: improved_nn_forward.1
= control target key start
LH: loop header
LB: loop body
LE: loop exit
PB: predicated region body
PF: predicated region fallthrough
CT: control target
= control target key end

     0   :  { %v299_v0 = vmov 0.0|0.0   ;;  %vm300_vm0 = vmmov 0   ;;  %v301_v3 = vmov 0.0   ;;  %vm30_vm1 = vcmask 130048   ;;  %s398_s1 = inlined_call_operand.vmem [shape: f32[16,128], index: 1, kind: input, shape index: {}]   ;;  %s399_s3 = inlined_call_operand.vmem [shape: f32[128,2], index: 3, kind: input, shape index: {}]   ;;  %s400_s0 = inlined_call_operand.vmem [shape: f32[8,16], index: 0, kind: input, shape index: {}]   ;;  %s401_s2 = inlined_call_operand.vmem [shape: f32[1,128], index: 2, kind: input, shape index: {}]   ;;  %s402_s4 = inlined_call_operand.vmem [shape: f32[1,2], index: 4, kind: input, shape index: {}]   ;;  %s403_s5 = inlined_call_operand.vmem [shape: f32[8,2], index: 5, kind: output, shape index: {}]  }
   0x1   :  { %269 = vmatprep.subr.bf16.mxu0 %v299_v0  ;;  %v21_v1 = vld [vmem:[%s398_s1] sm:$0xff]  ;;  %v22_v2 = vld [vmem:[%s398_s1 + $0x8] sm:$0xff]  ;;  %231 = vmatprep.mubr.msk.f32.mxu0 %vm300_vm0, %v301_v3  ;;  %v107_v7 = vld [vmem:[%s399_s3 + $0x10] sm:$0xff]  ;;  %vm198_vm2 = vcmask 15360  }
   0x2   :  { %v270_v4 = vpack.c.bf16 %v22_v2, %v21_v1  ;;  %272 = vmatprep.subr.bf16.mxu1 %v299_v0  ;;  %v105_v5 = vld [vmem:[%s399_s3] sm:$0xff]  ;;  %v106_v6 = vld [vmem:[%s399_s3 + $0x8] sm:$0xff]  ;;  %266 = vmatprep.mubr.msk.f32.mxu1 %vm300_vm0, %v301_v3  ;;  %v108_v9 = vld [vmem:[%s399_s3 + $0x18] sm:$0xff] }
   0x3   :  { %v273_v8 = vpack.c.bf16 %v106_v6, %v105_v5  ;;  %v20_v10 = vld [vmem:[%s400_s0] sm:$0xff]  ;;  %v276_v11 = vpack.c.bf16 %v108_v9, %v107_v7  ;;  %v110_v13 = vld [vmem:[%s399_s3 + $0x28] sm:$0xff]  ;;  %v111_v15 = vld [vmem:[%s399_s3 + $0x30] sm:$0xff] }
   0x4   :  { %271 = vmatpush3.bf16.msra.mxu0 %v270_v4  ;;  %v109_v12 = vld [vmem:[%s399_s3 + $0x20] sm:$0xff]  ;;  %v112_v16 = vld [vmem:[%s399_s3 + $0x38] sm:$0xff]  ;;  %v114_v19 = vld [vmem:[%s399_s3 + $0x48] sm:$0xff] }
   0x5   :  { %274 = vmatpush3.bf16.msra.mxu1 %v273_v8  ;;  %v279_v14 = vpack.c.bf16 %v110_v13, %v109_v12  ;;  %v282_v17 = vpack.c.bf16 %v112_v16, %v111_v15  ;;  %v113_v18 = vld [vmem:[%s399_s3 + $0x40] sm:$0xff]  ;;  %v115_v21 = vld [vmem:[%s399_s3 + $0x50] sm:$0xff]  ;;  %v116_v22 = vld [vmem:[%s399_s3 + $0x58] sm:$0xff] }
   0x6   :  { %275 = vmatprep.subr.bf16.mxu1 %v299_v0  ;;  %v285_v20 = vpack.c.bf16 %v114_v19, %v113_v18  ;;  %v288_v23 = vpack.c.bf16 %v116_v22, %v115_v21  ;;  %v117_v24 = vld [vmem:[%s399_s3 + $0x60] sm:$0xff]  ;;  %v118_v25 = vld [vmem:[%s399_s3 + $0x68] sm:$0xff]  ;;  %v119_v27 = vld [vmem:[%s399_s3 + $0x70] sm:$0xff] }
   0x7   :  { %232 = vmatmul.mubr.msk.f32.vlgmr.msra.gmra.mrb[0].mxu0 %vm30_vm1, %v20_v10  ;;  %v291_v26 = vpack.c.bf16 %v118_v25, %v117_v24  ;;  %v120_v28 = vld [vmem:[%s399_s3 + $0x78] sm:$0xff]  ;;  %v204_v30 = vld [vmem:[%s401_s2] ss:$0 sm:$0xff] }
   0x8   :  { %v294_v29 = vpack.c.bf16 %v120_v28, %v119_v27  ;;  %v206_v35 = vld [vmem:[%s402_s4] ss:$0 sm:$0xff] }
   0x9   :  { %277 = vmatpush3.bf16.msra.mxu1 %v276_v11 }
   0xa   :  { %278 = vmatprep.subr.bf16.mxu1 %v299_v0 }
   0xd   :  { %280 = vmatpush3.bf16.msra.mxu1 %v279_v14 }
   0xe   :  { %281 = vmatprep.subr.bf16.mxu1 %v299_v0 }
  0x11   :  { %283 = vmatpush3.bf16.msra.mxu1 %v282_v17 }
  0x12   :  { %284 = vmatprep.subr.bf16.mxu1 %v299_v0 }
  0x15   :  { %286 = vmatpush3.bf16.msra.mxu1 %v285_v20 }
  0x16   :  { %287 = vmatprep.subr.bf16.mxu1 %v299_v0 }
  0x19   :  { %289 = vmatpush3.bf16.msra.mxu1 %v288_v23 }
  0x1a   :  { %290 = vmatprep.subr.bf16.mxu1 %v299_v0 }
  0x1d   :  { %292 = vmatpush3.bf16.msra.mxu1 %v291_v26 }
  0x1e   :  { %293 = vmatprep.subr.bf16.mxu1 %v299_v0 }
  0x21   :  { %295 = vmatpush3.bf16.msra.mxu1 %v294_v29 }
  0xda   :  { %v100_v31 = vpop.f32.mrb[0].mxu0 }
  0xdb   :  { %v101_v32 = vadd.f32 %v204_v30, %v100_v31  ;;  %v233_v33 = vpop.f32.mrb[1].mxu0 }
  0xdd   :  { %v104_v34 = vmax.f32 %v101_v32, 0.0 }
  0xdf   :  { %267 = vmatmul.mubr.f32.vlgmr.msra.gmra.mrb[0].mxu1 %v104_v34 }
 0x1b2   :  { %v194_v36 = vpop.f32.mrb[0].mxu1 }
 0x1b3   :  { %v195_v37 = vadd.f32 %v206_v35, %v194_v36  ;;  %v268_v38 = vpop.f32.mrb[1].mxu1 }
 0x1b5   :  { %199 = vst.msk [vmem:[%s403_s5] sm:$0xff] %vm198_vm2, %v195_v37 }

</bundles_post_ra>
